<compile_context>
chip_gen: v7x
topology: tpu7x:2x2x1
jax: 0.10.0
libtpu: 0.0.40
codegen_flags: <defaults>
</compile_context>

<pallas_src>
import functools

import jax
import jax.numpy as jnp
from jax import lax
from jax.experimental import pallas as pl
from jax.experimental.pallas import tpu as pltpu


# ---------------------------------------------------------------------------
# Tile helper: largest divisor of `dim` that is <= cap and a multiple of align
# (falls back to the full dimension, which is always legal for BlockSpec).
# ---------------------------------------------------------------------------
def _pick_tile(dim, cap, align):
    if dim <= cap:
        return dim
    start = cap - (cap % align)
    for t in range(start, 0, -align):
        if dim % t == 0:
            return t
    return dim


# ---------------------------------------------------------------------------
# Kernel 1: tiled, pipelined dense linear  y = x @ W + b   (W stored as (Din, Dout))
# Grid = (M/tm, Dout/tn, Din/tk); f32 accumulator in VMEM scratch; reduction axis last.
# ---------------------------------------------------------------------------
def _linear_kernel(x_ref, w_ref, b_ref, o_ref, acc_ref):
    @pl.when(pl.program_id(2) == 0)
    def _():
        acc_ref[...] = jnp.zeros_like(acc_ref)

    acc_ref[...] += jnp.dot(x_ref[...], w_ref[...],
                            preferred_element_type=jnp.float32)

    @pl.when(pl.program_id(2) == pl.num_programs(2) - 1)
    def _():
        o_ref[...] = (acc_ref[...] + b_ref[...].astype(jnp.float32)).astype(o_ref.dtype)


def linear(x2d, w, b, *, tm_cap=256, tn_cap=512, tk_cap=512):
    # x2d: (M, Din), w: (Din, Dout), b: (1, Dout)
    M, Din = x2d.shape
    Dout = w.shape[1]
    # tm capped at 256 so f32 tiles (with double-buffering) stay well inside the
    # 64 MiB VMEM of v7x as well as the 16/32 MiB default scoped limits.
    tm = _pick_tile(M, tm_cap, 8)
    tn = _pick_tile(Dout, tn_cap, 128)
    tk = _pick_tile(Din, tk_cap, 128)
    grid = (M // tm, Dout // tn, Din // tk)
    return pl.pallas_call(
        _linear_kernel,
        out_shape=jax.ShapeDtypeStruct((M, Dout), x2d.dtype),
        grid_spec=pltpu.PrefetchScalarGridSpec(
            num_scalar_prefetch=0,
            grid=grid,
            in_specs=[
                pl.BlockSpec((tm, tk), lambda i, j, k: (i, k)),
                pl.BlockSpec((tk, tn), lambda i, j, k: (k, j)),
                pl.BlockSpec((1, tn), lambda i, j, k: (0, j)),
            ],
            out_specs=pl.BlockSpec((tm, tn), lambda i, j, k: (i, j)),
            scratch_shapes=[pltpu.VMEM((tm, tn), jnp.float32)],
        ),
        compiler_params=pltpu.CompilerParams(
            dimension_semantics=("parallel", "parallel", "arbitrary"),
            vmem_limit_bytes=32 * 1024 * 1024,  # explicit; safe on v5e/v6e/v7x
        ),
    )(x2d, w, b)


# ---------------------------------------------------------------------------
# Kernel 2: per-batch attention over the fused QKV block.
# Grid = (B,); each step sees qkv block (1, L, 3*D) and writes (1, L, D).
# Heads are sliced statically inside the kernel (no HBM-level head transposes).
# ---------------------------------------------------------------------------
def _attn_kernel(qkv_ref, o_ref, *, n_heads, d_model, scale):
    dh = d_model // n_heads
    for h in range(n_heads):  # static unrolled loop over heads
        # Operands stay in the input dtype (bf16 stays bf16); accumulation is f32.
        q = qkv_ref[0, :, h * dh:(h + 1) * dh] * scale                      # (L, Dh)
        k = qkv_ref[0, :, d_model + h * dh:d_model + (h + 1) * dh]          # (L, Dh)
        v = qkv_ref[0, :, 2 * d_model + h * dh:2 * d_model + (h + 1) * dh]  # (L, Dh)

        # Contract the last dim of both operands directly (no explicit k.T transpose).
        s = lax.dot_general(q, k, (((1,), (1,)), ((), ())),
                            preferred_element_type=jnp.float32)             # (L, L) f32

        # Softmax math in f32 (VPU/EUP); normalize with approximate reciprocal (EUP slot).
        m = jnp.max(s, axis=-1, keepdims=True)
        p = jnp.exp(s - m)
        denom = jnp.sum(p, axis=-1, keepdims=True)
        probs = (p * pl.reciprocal(denom, approx=True)).astype(v.dtype)

        o = jnp.dot(probs, v, preferred_element_type=jnp.float32)           # (L, Dh)
        o_ref[0, :, h * dh:(h + 1) * dh] = o.astype(o_ref.dtype)

    # TODO(synk): for long sequences (L >= ~1k) switch to an online-softmax (flash)
    # loop over KV tiles instead of materializing the full (L, L) score matrix.


def fused_attention(qkv, n_heads, d_model, scale):
    # qkv: (B, L, 3*D) -> out: (B, L, D)
    B, L, three_d = qkv.shape
    kernel = functools.partial(_attn_kernel, n_heads=n_heads,
                               d_model=d_model, scale=scale)
    return pl.pallas_call(
        kernel,
        out_shape=jax.ShapeDtypeStruct((B, L, d_model), qkv.dtype),
        grid=(B,),
        in_specs=[pl.BlockSpec((1, L, three_d), lambda b: (b, 0, 0))],
        out_specs=pl.BlockSpec((1, L, d_model), lambda b: (b, 0, 0)),
        compiler_params=pltpu.CompilerParams(
            dimension_semantics=("parallel",),
        ),
    )(qkv)


# ---------------------------------------------------------------------------
# MHA forward (glue in plain JAX; all hot paths are Pallas kernels above)
# ---------------------------------------------------------------------------
def mha_forward(x, params, n_heads):
    # x: (B, L, D)
    B, L, D = x.shape
    dh = D // n_heads
    scale = dh ** -0.5

    # Fuse q/k/v projections into ONE matmul with a concatenated (D, 3D) weight
    # (weight concat is a one-time parameter prep, negligible vs activations).
    wqkv = jnp.concatenate([params["wq"], params["wk"], params["wv"]], axis=1)  # (D, 3D)
    bqkv = jnp.concatenate([params["bq"], params["bk"], params["bv"]], axis=1)  # (1, 3D)

    qkv = linear(x.reshape(B * L, D), wqkv, bqkv).reshape(B, L, 3 * D)

    # Attention consumes / produces (B, L, D)-layout directly (no head transposes).
    att = fused_attention(qkv, n_heads, D, scale)                               # (B, L, D)

    out = linear(att.reshape(B * L, D), params["wo"], params["bo"])
    return out.reshape(B, L, D)


def init_mha_params(key, d_model, dtype=jnp.float32):
    # nn.Linear weight is (out, in) in PyTorch; we store the transpose (in, out)
    # so the kernel computes x @ W directly. Deterministic init from PRNGKey.
    keys = jax.random.split(key, 8)
    s = 0.02

    def w(k):
        return (jax.random.normal(k, (d_model, d_model), jnp.float32) * s).astype(dtype)

    def b(k):
        return (jax.random.normal(k, (1, d_model), jnp.float32) * s).astype(dtype)

    return {
        "wq": w(keys[0]), "bq": b(keys[1]),
        "wk": w(keys[2]), "bk": b(keys[3]),
        "wv": w(keys[4]), "bv": b(keys[5]),
        "wo": w(keys[6]), "bo": b(keys[7]),
    }


# TODO(synk): attn_bias input and training-mode attention dropout not implemented
# (forward evaluated in eval mode with attn_bias=None, matching the default call).

if __name__ == "__main__":
    B, L, D, H = 2, 8, 32, 4

    key = jax.random.PRNGKey(0)
    k_x, k_p = jax.random.split(key)
    x = jax.random.normal(k_x, (B, L, D), jnp.float32)
    params = init_mha_params(k_p, D)

    out = mha_forward(x, params, n_heads=H)
    jax.block_until_ready(out)
    assert out.shape == (B, L, D), out.shape

    # pure-JAX reference check
    def ref(x, p):
        q = x @ p["wq"] + p["bq"]
        k = x @ p["wk"] + p["bk"]
        v = x @ p["wv"] + p["bv"]

        def sh(t):
            return t.reshape(B, L, H, D // H).transpose(0, 2, 1, 3)

        qh, kh, vh = sh(q), sh(k), sh(v)
        s = jnp.einsum("bhqd,bhkd->bhqk", qh, kh) * (D // H) ** -0.5
        pr = jax.nn.softmax(s, axis=-1)
        o = jnp.einsum("bhqk,bhkd->bhqd", pr, vh)
        o = o.transpose(0, 2, 1, 3).reshape(B, L, D)
        return o @ p["wo"] + p["bo"]

    ref_out = ref(x, params)
    # slightly loose tolerance to accommodate the approximate reciprocal in softmax
    assert jnp.allclose(out, ref_out, atol=1e-3, rtol=1e-3), \
        float(jnp.max(jnp.abs(out - ref_out)))

    print("KERNEL_OK")
</pallas_src>

<mosaic_0001>
module attributes {stable_mosaic.version = 11 : i64} {
  func.func @_linear_kernel(%arg0: i32, %arg1: i32, %arg2: i32, %arg3: memref<16x32xf32, #tpu.memory_space<vmem>>, %arg4: memref<32x96xf32, #tpu.memory_space<vmem>>, %arg5: memref<1x96xf32, #tpu.memory_space<vmem>>, %arg6: memref<16x96xf32, #tpu.memory_space<vmem>>, %arg7: memref<16x96xf32, #tpu.memory_space<vmem>>) attributes {dimension_semantics = [#tpu.dimension_semantics<parallel>, #tpu.dimension_semantics<parallel>, #tpu.dimension_semantics<arbitrary>], iteration_bounds = array<i64: 1, 1, 1>, scalar_prefetch = 0 : i64, scratch_operands = 1 : i64, tpu.core_type = #tpu.core_type<tc>, window_params = [{transform_indices = @transform_0, window_bounds = array<i64: 16, 32>}, {transform_indices = @transform_1, window_bounds = array<i64: 32, 96>}, {transform_indices = @transform_2, window_bounds = array<i64: 1, 96>}, {transform_indices = @transform_3, window_bounds = array<i64: 16, 96>}]} {
    %c0_i32 = arith.constant 0 : i32
    %0 = arith.cmpi eq, %arg2, %c0_i32 : i32
    %1 = arith.extui %0 : i1 to i32
    %c0_i32_0 = arith.constant 0 : i32
    %2 = arith.cmpi ne, %1, %c0_i32_0 : i32
    scf.if %2 {
      %cst_10 = arith.constant 0.000000e+00 : f32
      %12 = vector.broadcast %cst_10 : f32 to vector<16x96xf32>
      %c0_11 = arith.constant 0 : index
      %c0_12 = arith.constant 0 : index
      %13 = vector.load %arg7[%c0_11, %c0_12] : memref<16x96xf32, #tpu.memory_space<vmem>>, vector<16x96xf32>
      tpu.vector_store %arg7[%c0_11, %c0_12], %12 {strides = array<i32>} : memref<16x96xf32, #tpu.memory_space<vmem>>, vector<16x96xf32>,
    } else {
    }
    %c0 = arith.constant 0 : index
    %c0_1 = arith.constant 0 : index
    %3 = vector.load %arg7[%c0, %c0_1] : memref<16x96xf32, #tpu.memory_space<vmem>>, vector<16x96xf32>
    %c0_2 = arith.constant 0 : index
    %c0_3 = arith.constant 0 : index
    %4 = vector.load %arg3[%c0_2, %c0_3] : memref<16x32xf32, #tpu.memory_space<vmem>>, vector<16x32xf32>
    %c0_4 = arith.constant 0 : index
    %c0_5 = arith.constant 0 : index
    %5 = vector.load %arg4[%c0_4, %c0_5] : memref<32x96xf32, #tpu.memory_space<vmem>>, vector<32x96xf32>
    %cst = arith.constant dense<0.000000e+00> : vector<16x96xf32>
    %6 = tpu.matmul %4, %5, %cst {dimension_numbers = #tpu.dot_dimension_numbers<[1], [0], [0], [1], [0, 0, 1, 1], [], []>} : vector<16x32xf32>, vector<32x96xf32>, vector<16x96xf32> -> vector<16x96xf32>
    %7 = arith.addf %3, %6 : vector<16x96xf32>
    %c0_6 = arith.constant 0 : index
    %c0_7 = arith.constant 0 : index
    %8 = vector.load %arg7[%c0_6, %c0_7] : memref<16x96xf32, #tpu.memory_space<vmem>>, vector<16x96xf32>
    tpu.vector_store %arg7[%c0_6, %c0_7], %7 {strides = array<i32>} : memref<16x96xf32, #tpu.memory_space<vmem>>, vector<16x96xf32>,
    %c0_i32_8 = arith.constant 0 : i32
    %9 = arith.cmpi eq, %arg2, %c0_i32_8 : i32
    %10 = arith.extui %9 : i1 to i32
    %c0_i32_9 = arith.constant 0 : i32
    %11 = arith.cmpi ne, %10, %c0_i32_9 : i32
    scf.if %11 {
      %c0_10 = arith.constant 0 : index
      %c0_11 = arith.constant 0 : index
      %12 = vector.load %arg7[%c0_10, %c0_11] : memref<16x96xf32, #tpu.memory_space<vmem>>, vector<16x96xf32>
      %c0_12 = arith.constant 0 : index
      %c0_13 = arith.constant 0 : index
      %13 = vector.load %arg5[%c0_12, %c0_13] : memref<1x96xf32, #tpu.memory_space<vmem>>, vector<1x96xf32>
      %14 = vector.broadcast %13 : vector<1x96xf32> to vector<16x96xf32>
      %15 = arith.addf %12, %14 : vector<16x96xf32>
      %c0_14 = arith.constant 0 : index
      %c0_15 = arith.constant 0 : index
      %16 = vector.load %arg6[%c0_14, %c0_15] : memref<16x96xf32, #tpu.memory_space<vmem>>, vector<16x96xf32>
      tpu.vector_store %arg6[%c0_14, %c0_15], %15 {strides = array<i32>} : memref<16x96xf32, #tpu.memory_space<vmem>>, vector<16x96xf32>,
    } else {
    }
    return
  }
  func.func @transform_0(%arg0: i32, %arg1: i32, %arg2: i32) -> (i32, i32) {
    %c0_i32 = arith.constant 0 : i32
    return %arg0, %arg2 : i32, i32
  }
  func.func @transform_1(%arg0: i32, %arg1: i32, %arg2: i32) -> (i32, i32) {
    %c0_i32 = arith.constant 0 : i32
    return %arg2, %arg1 : i32, i32
  }
  func.func @transform_2(%arg0: i32, %arg1: i32, %arg2: i32) -> (i32, i32) {
    %c0_i32 = arith.constant 0 : i32
    %c0_i32_0 = arith.constant 0 : i32
    return %c0_i32, %arg1 : i32, i32
  }
  func.func @transform_3(%arg0: i32, %arg1: i32, %arg2: i32) -> (i32, i32) {
    %c0_i32 = arith.constant 0 : i32
    return %arg0, %arg1 : i32, i32
  }
}

</mosaic_0001>

<bundles_post_ra>
// kernel: tpu_custom_call.1
= control target key start
LH: loop header
LB: loop body
LE: loop exit
PB: predicated region body
PF: predicated region fallthrough
CT: control target
= control target key end

     0   :  { %8 = vsyncpa [#allocation4], 0  ;;  %s365_s0 = inlined_call_operand.hbm [shape: f32[16,32], index: 0, kind: input, shape index: {}]   ;;  %s366_s1 = inlined_call_operand.hbm [shape: f32[32,96], index: 1, kind: input, shape index: {}]   ;;  %s367_s2 = inlined_call_operand.vmem [shape: f32[1,96], index: 2, kind: input, shape index: {}]   ;;  %s368_s3 = inlined_call_operand.hbm [shape: f32[16,96], index: 3, kind: output, shape index: {}]  }
   0x1   :  { %9 = vsyncpa [#allocation7], 0 }
   0x2   :  { %10 = vsyncpa [#allocation5], 0  ;;  %s285_s12 = smov [#allocation3]   ;;  %s213_s16 = scalar_lea.hbm %s365_s0, 256 }
   0x3   :  { %s16_s13 = sshll.u32 %s285_s12, 4  ;;  %p214_p0 = scmp.ne.s32.totalorder %s365_s0, %s213_s16  ;;  %s17_s13 = int_to_ptr.vmem [resolvable:$true] %s16_s13 }
   0x4   :  { %p217_p1 = scmp.lt.u32.totalorder %s213_s16, %s365_s0 }
   0x6   :  { %p219_p2 = pnand %p217_p1, %p214_p0 }
   0x8   :  { %222 = shalt.err (!%p219_p2)
}
   0x9   :  { %s223_s21 = scalar_lea.vmem %s17_s13, 256  ;;  %p228_p4 = scmp.lt.s32.totalorder %s17_s13, %s17_s13 }
   0xa   :  { %p224_p3 = scmp.ne.s32.totalorder %s17_s13, %s223_s21  ;;  %p229_p5 = scmp.lt.s32.totalorder %s223_s21, %s223_s21 }
   0xc   :  { %p230_p6 = por %p229_p5, %p228_p4 }
   0xe   :  { %p231_p7 = pnand %p230_p6, %p224_p3 }
  0x10   :  { %234 = shalt.err (!%p231_p7)
}
  0x11   :  { %s286_s22 = smov 128   ;;  %s287_s23 = smov 8  }
  0x12   :  { %22 = dma.hbm_to_vmem [thread:$0]  %s365_s0, 256, %s17_s13, [#allocation4], %s286_s22, %s286_s22, %s287_s23  }
  0x13   :  { %s288_s26 = smov [#allocation6]   ;;  %s235_s30 = scalar_lea.hbm %s366_s1, 512 }
  0x14   :  { %s28_s27 = sshll.u32 %s288_s26, 4  ;;  %p236_p8 = scmp.ne.s32.totalorder %s366_s1, %s235_s30  ;;  %s29_s27 = int_to_ptr.vmem [resolvable:$true] %s28_s27 }
  0x15   :  { %p239_p9 = scmp.lt.u32.totalorder %s235_s30, %s366_s1 }
  0x17   :  { %p241_p10 = pnand %p239_p9, %p236_p8 }
  0x19   :  { %244 = shalt.err (!%p241_p10)
}
  0x1a   :  { %s245_s8 = scalar_lea.vmem %s29_s27, 512  ;;  %p250_p12 = scmp.lt.s32.totalorder %s29_s27, %s29_s27 }
  0x1b   :  { %p246_p11 = scmp.ne.s32.totalorder %s29_s27, %s245_s8  ;;  %p251_p13 = scmp.lt.s32.totalorder %s245_s8, %s245_s8 }
  0x1d   :  { %p252_p0 = por %p251_p13, %p250_p12 }
  0x1f   :  { %p253_p1 = pnand %p252_p0, %p246_p11 }
  0x21   :  { %256 = shalt.err (!%p253_p1)
}
  0x22   :  { %34 = dma.hbm_to_vmem [thread:$0]  %s366_s1, 512, %s29_s27, [#allocation7], %s286_s22, %s286_s22, %s287_s23  }
  0x23   :  { %279 = dma.done.wait [#allocation4], 256  }
  0x24   :  { %280 = vsyncadd [#allocation4], 4294967040 }
  0x25   :  { %281 = dma.done.wait [#allocation7], 512  }
  0x26   :  { %282 = vsyncadd [#allocation7], 4294966784  ;;  %vm47_vm0 = vcmask 785408   ;;  %v289_v0 = vmov 0.0   ;;  %vm58_vm1 = vcmask 261120   ;;  %v54_v1 = vld [vmem:[#allocation6] sm:$0xff] }
  0x27   :  { %49 = vst.msk [vmem:[#allocation2 + $0x8] sm:$0xff] %vm47_vm0, %v289_v0  ;;  %48 = vst.msk [vmem:[#allocation2] sm:$0xff] %vm47_vm0, %v289_v0  ;;  %v55_v2 = vld [vmem:[#allocation6 + $0x8] sm:$0xff]  ;;  %v56_v3 = vld [vmem:[#allocation6 + $0x10] sm:$0xff]  ;;  %s290_s11 = smov [#allocation8]  }
  0x28   :  { %v199_v4 = vpack.c.bf16 %v55_v2, %v54_v1  ;;  %v57_v5 = vld [vmem:[#allocation6 + $0x18] sm:$0xff]  ;;  %v52_v6 = vld [vmem:[#allocation3] sm:$0xff]  ;;  %v181_v15 = vld [vmem:[%s367_s2] ss:$0 sm:$0xff]  ;;  %s166_s12 = sshll.u32 %s290_s11, 4  ;;  %s167_s12 = int_to_ptr.vmem [resolvable:$true] %s166_s12 }
  0x29   :  { %v203_v7 = vpack.c.bf16 %v57_v5, %v56_v3  ;;  %196 = vmatprep.mubr.msk.f32.mxu0 %vm58_vm1, %v52_v6  ;;  %v53_v8 = vld [vmem:[#allocation3 + $0x8] sm:$0xff]  ;;  %s257_s13 = scalar_lea.vmem %s167_s12, 256  ;;  %p262_p3 = scmp.lt.s32.totalorder %s167_s12, %s167_s12 }
  0x2a   :  { %200 = vmatprep.subr.bf16.mxu0 %v199_v4  ;;  %p258_p2 = scmp.ne.s32.totalorder %s167_s12, %s257_s13  ;;  %p263_p4 = scmp.lt.s32.totalorder %s257_s13, %s257_s13 }
  0x2b   :  { %202 = vmatpush3.bf16.msra.mxu0 %v199_v4 }
  0x2c   :  { %204 = vmatprep.subr.bf16.mxu0 %v203_v7  ;;  %p264_p5 = por %p263_p4, %p262_p3 }
  0x2e   :  { %v51_v9 = vld [vmem:[#allocation2 + $0x8] sm:$0xff]  ;;  %v50_v10 = vld [vmem:[#allocation2] sm:$0xff]  ;;  %p265_p6 = pnand %p264_p5, %p258_p2 }
  0x2f   :  { %206 = vmatpush3.bf16.msra.mxu0 %v203_v7 }
  0x32   :  { %197 = vmatmul.mubr.msk.f32.vlgmr.msra.gmra.mrb[0].mxu0 %vm58_vm1, %v53_v8 }
 0x105   :  { %v198_v11 = vpop.f32.mrb[0].mxu0 }
 0x106   :  { %v141_v12 = vadd.f32 %v198_v11, %v51_v9  ;;  %v131_v13 = vpop.f32.mrb[1].mxu0 }
 0x107   :  { %v140_v14 = vadd.f32 %v131_v13, %v50_v10 }
 0x108   :  { %144 = vst.msk [vmem:[#allocation2 + $0x8] sm:$0xff] %vm47_vm0, %v141_v12 }
 0x109   :  { %143 = vst.msk [vmem:[#allocation2] sm:$0xff] %vm47_vm0, %v140_v14 }
 0x10f   :  { %v149_v16 = vld [vmem:[#allocation2 + $0x8] sm:$0xff] }
 0x110   :  { %v148_v17 = vld [vmem:[#allocation2] sm:$0xff]  ;;  %v158_v18 = vadd.f32 %v181_v15, %v149_v16 }
 0x111   :  { %v157_v19 = vadd.f32 %v181_v15, %v148_v17 }
 0x112   :  { %160 = vst.msk [vmem:[#allocation8 + $0x8] sm:$0xff] %vm47_vm0, %v158_v18 }
 0x113   :  { %159 = vst.msk [vmem:[#allocation8] sm:$0xff] %vm47_vm0, %v157_v19 }
 0x114   :  { %268 = shalt.err (!%p265_p6)
}
 0x115   :  { %s269_s15 = scalar_lea.hbm %s368_s3, 256 }
 0x116   :  { %p270_p7 = scmp.ne.s32.totalorder %s368_s3, %s269_s15  ;;  %p273_p8 = scmp.lt.u32.totalorder %s269_s15, %s368_s3 }
 0x118   :  { %p275_p9 = pnand %p273_p8, %p270_p7 }
 0x11a   :  { %278 = shalt.err (!%p275_p9)
}
 0x11b   :  { %172 = dma.vmem_to_hbm [thread:$0]  %s167_s12, 256, %s368_s3, [#allocation5], %s286_s22, %s286_s22, %s287_s23  }
 0x11c   :  { %283 = dma.done.wait [#allocation5], 256  }
 0x11d   :  { %284 = vsyncadd [#allocation5], 4294967040 }
 0x11e   :  { %176 = vsyncpa [#allocation4], 1 }
 0x11f   :  { %177 = vsyncpa [#allocation7], 1 }
 0x120   :  { %178 = vsyncpa [#allocation5], 1 }

</bundles_post_ra>
